<compile_context>
chip_gen: v5e
topology: v5e:2x2
jax: 0.10.0
libtpu: 0.0.40
codegen_flags: <defaults>
</compile_context>

<pallas_src>
import jax
import jax.numpy as jnp
from jax import lax
from jax.experimental import pallas as pl
from jax.experimental.pallas import tpu as pltpu

# config (the `cfg` dict of the PyTorch module), small deterministic sizes
SEQ = 8          # sequence length
BATCH = 1        # torch.squeeze + BatchNorm1d(hidden) implies batch == 1
IN_DIM = 8       # cfg['input_dim']
HID = 32         # cfg['hidden_dim']
OUT = 16         # cfg['output_dim']
LAYERS = 1       # cfg['layers']  (single layer; dropout therefore inert)
EPS = 1e-5       # BatchNorm1d default eps

LANE = 128       # lane width; 4*HID == LANE by construction
G4 = 4 * HID
IN_PAD = 16      # W_ih^T rows padded to one full bf16 sublane tile
assert G4 == LANE and IN_DIM <= IN_PAD and HID % 8 == 0

# bf16 weight-slab layout (rows, all sections 16-sublane aligned)
ROW_WIH = 0                      # rows  0..15 : W_ih^T  (I->16, 4H), gate order (i,f,o,g)
ROW_WHH = ROW_WIH + IN_PAD       # rows 16..47 : W_hh^T  (H, 4H)
ROW_WOUT = ROW_WHH + HID         # rows 48..79 : W_out^T (H, 128), cols OUT..127 zero
W_ROWS = ROW_WOUT + HID          # 80


def lstm_bn_linear_kernel(x_ref, w_ref, v_ref, out_ref, hs_ref):
    """Single-program kernel: everything lives in VMEM / vregs.

    x_ref:   (S, 16)   squeezed, lane-padded input sequence (f32)
    w_ref:   (80, 128) packed bf16 weight slab (16-row aligned sections)
    v_ref:   (8, 128)  f32 vector block: [bias; gamma; beta; b_out; 0...]
    out_ref: (S, 128)  lane-dense output (cols OUT..127 are padding)
    hs_ref:  (S, H)    f32 VMEM scratch for the per-step hidden rows
    """
    H = HID
    bf = jnp.bfloat16

    # Static, tile-aligned slices of the bf16 weight slab (views, no copies).
    wih = w_ref[ROW_WIH:ROW_WIH + IN_PAD, :]           # (16, 4H)
    whh = w_ref[ROW_WHH:ROW_WHH + H, :]                # (H, 4H)
    wout = w_ref[ROW_WOUT:ROW_WOUT + H, :]             # (H, 128)
    vecs = v_ref[...]                                  # (8, 128) f32
    b = vecs[0:1, :]                                   # (1, 4H) combined bias (g-lanes pre-doubled)
    gamma = vecs[1:2, :H]                              # (1, H)
    beta = vecs[2:3, :H]                               # (1, H)
    bout = vecs[3:4, :]                                # (1, 128) zero-padded

    # Input projection for all timesteps at once (one MXU pass, bf16 operands,
    # f32 accumulation).  Candidate-gate lanes already carry the 2x factor.
    gx = jnp.dot(x_ref[...].astype(bf), wih,
                 preferred_element_type=jnp.float32) + b          # (S, 4H) f32

    # Fully-unrolled recurrence; state stays in vregs.  Gate lane order after
    # host-side permutation: [i | f | o | g], g-lanes pre-scaled by 2 so ONE
    # sigmoid over the full 128-lane vreg covers all four gates
    # (tanh(z) = 2*sigmoid(2z) - 1).
    h = jnp.zeros((1, H), jnp.float32)
    c = jnp.zeros((1, H), jnp.float32)
    sum_h = jnp.zeros((1, H), jnp.float32)
    sum_h2 = jnp.zeros((1, H), jnp.float32)
    for t in range(SEQ):
        g = gx[t:t + 1, :] + jnp.dot(h.astype(bf), whh,
                                     preferred_element_type=jnp.float32)  # (1,4H)
        s = jax.nn.sigmoid(g)                          # single EUP pass per step
        i_g = s[:, 0:H]
        f_g = s[:, H:2 * H]
        o_g = s[:, 2 * H:3 * H]
        g_g = 2.0 * s[:, 3 * H:4 * H] - 1.0            # = tanh(candidate pre-act)
        c = f_g * c + i_g * g_g
        h = o_g * jnp.tanh(c)
        hs_ref[t:t + 1, :] = h                         # vst slot, overlaps next step
        sum_h = sum_h + h                              # in-loop BN statistics
        sum_h2 = sum_h2 + h * h

    # BatchNorm1d, training mode (biased variance over the sequence axis),
    # statistics already accumulated; fold into a single scale/shift.
    inv_n = jnp.float32(1.0 / SEQ)
    mean = sum_h * inv_n
    var = sum_h2 * inv_n - mean * mean
    scale = gamma * lax.rsqrt(var + EPS)               # (1, H)
    shift = beta - mean * scale

    hn = hs_ref[...] * scale + shift                   # (S, H)

    # hidden2out Linear, lane-dense (OUT padded to 128 zero columns).
    out_ref[...] = jnp.dot(hn.astype(bf), wout,
                           preferred_element_type=jnp.float32) + bout


@jax.jit
def baseline_lstm_forward(sequence, w_slab, vec_block):
    """sequence: (SEQ, 1, IN_DIM) time-major, like nn.LSTM default."""
    S, B, I = sequence.shape
    assert B == 1, "torch.squeeze + BatchNorm1d(hidden_dim) requires batch == 1"
    x = sequence[:, 0, :]                                   # (S, I)
    x = jnp.pad(x, ((0, 0), (0, IN_PAD - I)))               # (S, 16)

    flops = 2 * S * IN_PAD * G4 + 2 * S * HID * G4 + 2 * S * HID * LANE
    transcendentals = S * (G4 + HID) + HID                  # sigmoid + tanh(c) + rsqrt
    bytes_accessed = (x.size * 4 + w_slab.size * 2
                      + vec_block.size * 4 + S * LANE * 4)

    vmem = pl.BlockSpec(memory_space=pltpu.MemorySpace.VMEM)
    out_padded = pl.pallas_call(
        lstm_bn_linear_kernel,
        out_shape=jax.ShapeDtypeStruct((S, LANE), jnp.float32),
        in_specs=[vmem, vmem, vmem],
        out_specs=vmem,
        scratch_shapes=[pltpu.VMEM((SEQ, HID), jnp.float32)],
        cost_estimate=pl.CostEstimate(
            flops=flops,
            transcendentals=transcendentals,
            bytes_accessed=bytes_accessed),
    )(x, w_slab, vec_block)
    return out_padded[:, :OUT]                              # (S, OUT)


def init_params(key):
    """Deterministic parameter init matching the module's shapes.

    LSTM weights: xavier_normal_ (as in __init__); biases: deterministic small
    values; BatchNorm affine: gamma=1, beta=0 (PyTorch defaults);
    hidden2out.weight: xavier_normal_, bias: zeros.  PyTorch gate order (i,f,g,o).
    """
    k1, k2, k3, k4, k5 = jax.random.split(key, 5)

    def xavier(k, shape):  # shape = (fan_out, fan_in)
        std = jnp.sqrt(2.0 / (shape[0] + shape[1]))
        return std * jax.random.normal(k, shape, jnp.float32)

    return {
        "w_ih": xavier(k1, (4 * HID, IN_DIM)),          # torch weight_ih_l0
        "w_hh": xavier(k2, (4 * HID, HID)),             # torch weight_hh_l0
        "b_ih": 0.01 * jax.random.normal(k3, (4 * HID,), jnp.float32),
        "b_hh": 0.01 * jax.random.normal(k4, (4 * HID,), jnp.float32),
        "gamma": jnp.ones((HID,), jnp.float32),
        "beta": jnp.zeros((HID,), jnp.float32),
        "w_out": xavier(k5, (OUT, HID)),                # hidden2out.weight
        "b_out": jnp.zeros((OUT,), jnp.float32),
    }


def pack_params(p):
    """Pack parameters into a bf16 weight slab (80,128) + f32 vector block (8,128).

    * Gate columns permuted from PyTorch order (i,f,g,o) to (i,f,o,g).
    * Candidate-gate columns of W_ih^T / W_hh^T / bias pre-scaled by 2 so the
      kernel can use tanh(z) = 2*sigmoid(2z) - 1 with a single sigmoid pass
      (doubling is an exact exponent shift -> numerics unchanged).
    * Weight sections cast to bf16 host-side (halves the DMA, same RNE
      rounding the kernel would have applied).
    """
    H = HID
    perm = jnp.concatenate([jnp.arange(0, H), jnp.arange(H, 2 * H),
                            jnp.arange(3 * H, 4 * H), jnp.arange(2 * H, 3 * H)])
    lane_scale = jnp.concatenate([jnp.ones((3 * H,), jnp.float32),
                                  jnp.full((H,), 2.0, jnp.float32)])

    wih_t = jnp.transpose(p["w_ih"])[:, perm] * lane_scale         # (I, 4H)
    wih_t = jnp.pad(wih_t, ((0, IN_PAD - IN_DIM), (0, 0)))         # (16, 4H)
    whh_t = jnp.transpose(p["w_hh"])[:, perm] * lane_scale         # (H, 4H)
    wout_t = jnp.pad(jnp.transpose(p["w_out"]),                    # (H, OUT) -> (H, 128)
                     ((0, 0), (0, LANE - OUT)))
    w_slab = jnp.concatenate([wih_t, whh_t, wout_t],
                             axis=0).astype(jnp.bfloat16)
    assert w_slab.shape == (W_ROWS, LANE)

    b = (p["b_ih"] + p["b_hh"])[perm] * lane_scale                 # (4H,)
    vec_block = jnp.zeros((8, LANE), jnp.float32)
    vec_block = vec_block.at[0, :].set(b)                          # 4H == LANE
    vec_block = vec_block.at[1, :H].set(p["gamma"])
    vec_block = vec_block.at[2, :H].set(p["beta"])
    vec_block = vec_block.at[3, :OUT].set(p["b_out"])
    return w_slab, vec_block


def reference_forward(sequence, p):
    """Pure-JAX reference (PyTorch gate order, unpacked params).

    Mirrors the kernel's matmul numerics: bf16 MXU operands with f32
    accumulation, f32 element-wise math, biased batch-norm statistics;
    uses tanh directly (the kernel's 2*sigmoid(2z)-1 is the same function).
    """
    bf = jnp.bfloat16
    x = sequence[:, 0, :]
    wih_t = jnp.transpose(p["w_ih"]).astype(bf)                    # (I, 4H) order i,f,g,o
    whh_t = jnp.transpose(p["w_hh"]).astype(bf)
    b = (p["b_ih"] + p["b_hh"])[None, :]
    gx = jnp.dot(x.astype(bf), wih_t,
                 preferred_element_type=jnp.float32) + b           # (S, 4H)

    def step(carry, g_x):
        h, c = carry
        g = g_x[None, :] + jnp.dot(h.astype(bf), whh_t,
                                   preferred_element_type=jnp.float32)
        i = jax.nn.sigmoid(g[:, 0 * HID:1 * HID])
        f = jax.nn.sigmoid(g[:, 1 * HID:2 * HID])
        gg = jnp.tanh(g[:, 2 * HID:3 * HID])
        o = jax.nn.sigmoid(g[:, 3 * HID:4 * HID])
        c = f * c + i * gg
        h = o * jnp.tanh(c)
        return (h, c), h[0]

    h0 = jnp.zeros((1, HID), jnp.float32)
    c0 = jnp.zeros((1, HID), jnp.float32)
    _, hs = lax.scan(step, (h0, c0), gx)                           # (S, H)
    mean = jnp.mean(hs, axis=0, keepdims=True)
    var = jnp.mean((hs - mean) ** 2, axis=0, keepdims=True)
    hn = (hs - mean) * lax.rsqrt(var + EPS)
    hn = hn * p["gamma"][None, :] + p["beta"][None, :]
    wout_t = jnp.transpose(p["w_out"]).astype(bf)
    return jnp.dot(hn.astype(bf), wout_t,
                   preferred_element_type=jnp.float32) + p["b_out"][None, :]


if __name__ == "__main__":
    key = jax.random.PRNGKey(0)
    k_x, k_p = jax.random.split(key)
    sequence = jax.random.normal(k_x, (SEQ, BATCH, IN_DIM), jnp.float32)
    params = init_params(k_p)
    w_slab, vec_block = pack_params(params)

    out = baseline_lstm_forward(sequence, w_slab, vec_block)
    out = jax.block_until_ready(out)
    assert out.shape == (SEQ, OUT), out.shape

    ref = reference_forward(sequence, params)
    max_err = float(jnp.max(jnp.abs(out - ref)))
    assert jnp.allclose(out, ref, atol=2e-3, rtol=2e-3), max_err

    print("KERNEL_OK")
</pallas_src>

<mosaic_0001>
module attributes {stable_mosaic.version = 11 : i64} {
  func.func @lstm_bn_linear_kernel(%arg0: memref<8x16xf32, #tpu.memory_space<vmem>>, %arg1: memref<80x128xbf16, #tpu.memory_space<vmem>>, %arg2: memref<8x128xf32, #tpu.memory_space<vmem>>, %arg3: memref<8x128xf32, #tpu.memory_space<vmem>>, %arg4: memref<8x32xf32, #tpu.memory_space<vmem>>) attributes {dimension_semantics = [], scalar_prefetch = 0 : i64, scratch_operands = 1 : i64, tpu.core_type = #tpu.core_type<tc>} {
    %c0 = arith.constant 0 : index
    %c0_0 = arith.constant 0 : index
    %0 = vector.load %arg1[%c0, %c0_0] : memref<80x128xbf16, #tpu.memory_space<vmem>>, vector<16x128xbf16>
    %c16 = arith.constant 16 : index
    %c0_1 = arith.constant 0 : index
    %1 = vector.load %arg1[%c16, %c0_1] : memref<80x128xbf16, #tpu.memory_space<vmem>>, vector<32x128xbf16>
    %c48 = arith.constant 48 : index
    %c0_2 = arith.constant 0 : index
    %2 = vector.load %arg1[%c48, %c0_2] : memref<80x128xbf16, #tpu.memory_space<vmem>>, vector<32x128xbf16>
    %c0_3 = arith.constant 0 : index
    %c0_4 = arith.constant 0 : index
    %3 = vector.load %arg2[%c0_3, %c0_4] : memref<8x128xf32, #tpu.memory_space<vmem>>, vector<8x128xf32>
    %4 = vector.extract_strided_slice %3 {offsets = [0, 0], sizes = [1, 128], strides = [1, 1]} : vector<8x128xf32> to vector<1x128xf32>
    %5 = vector.extract_strided_slice %3 {offsets = [1, 0], sizes = [1, 32], strides = [1, 1]} : vector<8x128xf32> to vector<1x32xf32>
    %6 = vector.extract_strided_slice %3 {offsets = [2, 0], sizes = [1, 32], strides = [1, 1]} : vector<8x128xf32> to vector<1x32xf32>
    %7 = vector.extract_strided_slice %3 {offsets = [3, 0], sizes = [1, 128], strides = [1, 1]} : vector<8x128xf32> to vector<1x128xf32>
    %c0_5 = arith.constant 0 : index
    %c0_6 = arith.constant 0 : index
    %8 = vector.load %arg0[%c0_5, %c0_6] : memref<8x16xf32, #tpu.memory_space<vmem>>, vector<8x16xf32>
    %9 = arith.truncf %8 : vector<8x16xf32> to vector<8x16xbf16>
    %cst = arith.constant dense<0.000000e+00> : vector<8x128xf32>
    %10 = tpu.matmul %9, %0, %cst {dimension_numbers = #tpu.dot_dimension_numbers<[1], [0], [0], [1], [0, 0, 1, 1], [], []>} : vector<8x16xbf16>, vector<16x128xbf16>, vector<8x128xf32> -> vector<8x128xf32>
    %11 = vector.broadcast %4 : vector<1x128xf32> to vector<8x128xf32>
    %12 = arith.addf %10, %11 : vector<8x128xf32>
    %cst_7 = arith.constant 0.000000e+00 : f32
    %13 = vector.broadcast %cst_7 : f32 to vector<1x32xf32>
    %cst_8 = arith.constant 0.000000e+00 : f32
    %14 = vector.broadcast %cst_8 : f32 to vector<1x32xf32>
    %cst_9 = arith.constant 0.000000e+00 : f32
    %15 = vector.broadcast %cst_9 : f32 to vector<1x32xf32>
    %cst_10 = arith.constant 0.000000e+00 : f32
    %16 = vector.broadcast %cst_10 : f32 to vector<1x32xf32>
    %17 = vector.extract_strided_slice %12 {offsets = [0, 0], sizes = [1, 128], strides = [1, 1]} : vector<8x128xf32> to vector<1x128xf32>
    %18 = arith.truncf %13 : vector<1x32xf32> to vector<1x32xbf16>
    %cst_11 = arith.constant dense<0.000000e+00> : vector<1x128xf32>
    %19 = tpu.matmul %18, %1, %cst_11 {dimension_numbers = #tpu.dot_dimension_numbers<[1], [0], [0], [1], [0, 0, 1, 1], [], []>} : vector<1x32xbf16>, vector<32x128xbf16>, vector<1x128xf32> -> vector<1x128xf32>
    %20 = arith.addf %17, %19 : vector<1x128xf32>
    %21 = arith.negf %20 : vector<1x128xf32>
    %22 = math.exp %21 : vector<1x128xf32>
    %cst_12 = arith.constant 1.000000e+00 : f32
    %23 = vector.broadcast %cst_12 : f32 to vector<1x128xf32>
    %24 = arith.addf %23, %22 : vector<1x128xf32>
    %25 = arith.divf %23, %24 : vector<1x128xf32>
    %26 = vector.extract_strided_slice %25 {offsets = [0, 0], sizes = [1, 32], strides = [1, 1]} : vector<1x128xf32> to vector<1x32xf32>
    %27 = vector.extract_strided_slice %25 {offsets = [0, 32], sizes = [1, 32], strides = [1, 1]} : vector<1x128xf32> to vector<1x32xf32>
    %28 = vector.extract_strided_slice %25 {offsets = [0, 64], sizes = [1, 32], strides = [1, 1]} : vector<1x128xf32> to vector<1x32xf32>
    %29 = vector.extract_strided_slice %25 {offsets = [0, 96], sizes = [1, 32], strides = [1, 1]} : vector<1x128xf32> to vector<1x32xf32>
    %cst_13 = arith.constant 2.000000e+00 : f32
    %30 = vector.broadcast %cst_13 : f32 to vector<1x32xf32>
    %31 = arith.mulf %30, %29 : vector<1x32xf32>
    %cst_14 = arith.constant 1.000000e+00 : f32
    %32 = vector.broadcast %cst_14 : f32 to vector<1x32xf32>
    %33 = arith.subf %31, %32 : vector<1x32xf32>
    %34 = arith.mulf %27, %14 : vector<1x32xf32>
    %35 = arith.mulf %26, %33 : vector<1x32xf32>
    %36 = arith.addf %34, %35 : vector<1x32xf32>
    %37 = math.tanh %36 : vector<1x32xf32>
    %38 = arith.mulf %28, %37 : vector<1x32xf32>
    %c0_15 = arith.constant 0 : index
    %c0_16 = arith.constant 0 : index
    %39 = vector.load %arg4[%c0_15, %c0_16] : memref<8x32xf32, #tpu.memory_space<vmem>>, vector<1x32xf32>
    tpu.vector_store %arg4[%c0_15, %c0_16], %38 {strides = array<i32>} : memref<8x32xf32, #tpu.memory_space<vmem>>, vector<1x32xf32>,
    %40 = arith.addf %15, %38 : vector<1x32xf32>
    %41 = arith.mulf %38, %38 : vector<1x32xf32>
    %42 = arith.addf %16, %41 : vector<1x32xf32>
    %43 = vector.extract_strided_slice %12 {offsets = [1, 0], sizes = [1, 128], strides = [1, 1]} : vector<8x128xf32> to vector<1x128xf32>
    %44 = arith.truncf %38 : vector<1x32xf32> to vector<1x32xbf16>
    %cst_17 = arith.constant dense<0.000000e+00> : vector<1x128xf32>
    %45 = tpu.matmul %44, %1, %cst_17 {dimension_numbers = #tpu.dot_dimension_numbers<[1], [0], [0], [1], [0, 0, 1, 1], [], []>} : vector<1x32xbf16>, vector<32x128xbf16>, vector<1x128xf32> -> vector<1x128xf32>
    %46 = arith.addf %43, %45 : vector<1x128xf32>
    %47 = arith.negf %46 : vector<1x128xf32>
    %48 = math.exp %47 : vector<1x128xf32>
    %cst_18 = arith.constant 1.000000e+00 : f32
    %49 = vector.broadcast %cst_18 : f32 to vector<1x128xf32>
    %50 = arith.addf %49, %48 : vector<1x128xf32>
    %51 = arith.divf %49, %50 : vector<1x128xf32>
    %52 = vector.extract_strided_slice %51 {offsets = [0, 0], sizes = [1, 32], strides = [1, 1]} : vector<1x128xf32> to vector<1x32xf32>
    %53 = vector.extract_strided_slice %51 {offsets = [0, 32], sizes = [1, 32], strides = [1, 1]} : vector<1x128xf32> to vector<1x32xf32>
    %54 = vector.extract_strided_slice %51 {offsets = [0, 64], sizes = [1, 32], strides = [1, 1]} : vector<1x128xf32> to vector<1x32xf32>
    %55 = vector.extract_strided_slice %51 {offsets = [0, 96], sizes = [1, 32], strides = [1, 1]} : vector<1x128xf32> to vector<1x32xf32>
    %cst_19 = arith.constant 2.000000e+00 : f32
    %56 = vector.broadcast %cst_19 : f32 to vector<1x32xf32>
    %57 = arith.mulf %56, %55 : vector<1x32xf32>
    %cst_20 = arith.constant 1.000000e+00 : f32
    %58 = vector.broadcast %cst_20 : f32 to vector<1x32xf32>
    %59 = arith.subf %57, %58 : vector<1x32xf32>
    %60 = arith.mulf %53, %36 : vector<1x32xf32>
    %61 = arith.mulf %52, %59 : vector<1x32xf32>
    %62 = arith.addf %60, %61 : vector<1x32xf32>
    %63 = math.tanh %62 : vector<1x32xf32>
    %64 = arith.mulf %54, %63 : vector<1x32xf32>
    %c1 = arith.constant 1 : index
    %c0_21 = arith.constant 0 : index
    %65 = vector.load %arg4[%c1, %c0_21] : memref<8x32xf32, #tpu.memory_space<vmem>>, vector<1x32xf32>
    tpu.vector_store %arg4[%c1, %c0_21], %64 {strides = array<i32>} : memref<8x32xf32, #tpu.memory_space<vmem>>, vector<1x32xf32>,
    %66 = arith.addf %40, %64 : vector<1x32xf32>
    %67 = arith.mulf %64, %64 : vector<1x32xf32>
    %68 = arith.addf %42, %67 : vector<1x32xf32>
    %69 = vector.extract_strided_slice %12 {offsets = [2, 0], sizes = [1, 128], strides = [1, 1]} : vector<8x128xf32> to vector<1x128xf32>
    %70 = arith.truncf %64 : vector<1x32xf32> to vector<1x32xbf16>
    %cst_22 = arith.constant dense<0.000000e+00> : vector<1x128xf32>
    %71 = tpu.matmul %70, %1, %cst_22 {dimension_numbers = #tpu.dot_dimension_numbers<[1], [0], [0], [1], [0, 0, 1, 1], [], []>} : vector<1x32xbf16>, vector<32x128xbf16>, vector<1x128xf32> -> vector<1x128xf32>
    %72 = arith.addf %69, %71 : vector<1x128xf32>
    %73 = arith.negf %72 : vector<1x128xf32>
    %74 = math.exp %73 : vector<1x128xf32>
    %cst_23 = arith.constant 1.000000e+00 : f32
    %75 = vector.broadcast %cst_23 : f32 to vector<1x128xf32>
    %76 = arith.addf %75, %74 : vector<1x128xf32>
    %77 = arith.divf %75, %76 : vector<1x128xf32>
    %78 = vector.extract_strided_slice %77 {offsets = [0, 0], sizes = [1, 32], strides = [1, 1]} : vector<1x128xf32> to vector<1x32xf32>
    %79 = vector.extract_strided_slice %77 {offsets = [0, 32], sizes = [1, 32], strides = [1, 1]} : vector<1x128xf32> to vector<1x32xf32>
    %80 = vector.extract_strided_slice %77 {offsets = [0, 64], sizes = [1, 32], strides = [1, 1]} : vector<1x128xf32> to vector<1x32xf32>
    %81 = vector.extract_strided_slice %77 {offsets = [0, 96], sizes = [1, 32], strides = [1, 1]} : vector<1x128xf32> to vector<1x32xf32>
    %cst_24 = arith.constant 2.000000e+00 : f32
    %82 = vector.broadcast %cst_24 : f32 to vector<1x32xf32>
    %83 = arith.mulf %82, %81 : vector<1x32xf32>
    %cst_25 = arith.constant 1.000000e+00 : f32
    %84 = vector.broadcast %cst_25 : f32 to vector<1x32xf32>
    %85 = arith.subf %83, %84 : vector<1x32xf32>
    %86 = arith.mulf %79, %62 : vector<1x32xf32>
    %87 = arith.mulf %78, %85 : vector<1x32xf32>
    %88 = arith.addf %86, %87 : vector<1x32xf32>
    %89 = math.tanh %88 : vector<1x32xf32>
    %90 = arith.mulf %80, %89 : vector<1x32xf32>
    %c2 = arith.constant 2 : index
    %c0_26 = arith.constant 0 : index
    %91 = vector.load %arg4[%c2, %c0_26] : memref<8x32xf32, #tpu.memory_space<vmem>>, vector<1x32xf32>
    tpu.vector_store %arg4[%c2, %c0_26], %90 {strides = array<i32>} : memref<8x32xf32, #tpu.memory_space<vmem>>, vector<1x32xf32>,
    %92 = arith.addf %66, %90 : vector<1x32xf32>
    %93 = arith.mulf %90, %90 : vector<1x32xf32>
    %94 = arith.addf %68, %93 : vector<1x32xf32>
    %95 = vector.extract_strided_slice %12 {offsets = [3, 0], sizes = [1, 128], strides = [1, 1]} : vector<8x128xf32> to vector<1x128xf32>
    %96 = arith.truncf %90 : vector<1x32xf32> to vector<1x32xbf16>
    %cst_27 = arith.constant dense<0.000000e+00> : vector<1x128xf32>
    %97 = tpu.matmul %96, %1, %cst_27 {dimension_numbers = #tpu.dot_dimension_numbers<[1], [0], [0], [1], [0, 0, 1, 1], [], []>} : vector<1x32xbf16>, vector<32x128xbf16>, vector<1x128xf32> -> vector<1x128xf32>
    %98 = arith.addf %95, %97 : vector<1x128xf32>
    %99 = arith.negf %98 : vector<1x128xf32>
    %100 = math.exp %99 : vector<1x128xf32>
    %cst_28 = arith.constant 1.000000e+00 : f32
    %101 = vector.broadcast %cst_28 : f32 to vector<1x128xf32>
    %102 = arith.addf %101, %100 : vector<1x128xf32>
    %103 = arith.divf %101, %102 : vector<1x128xf32>
    %104 = vector.extract_strided_slice %103 {offsets = [0, 0], sizes = [1, 32], strides = [1, 1]} : vector<1x128xf32> to vector<1x32xf32>
    %105 = vector.extract_strided_slice %103 {offsets = [0, 32], sizes = [1, 32], strides = [1, 1]} : vector<1x128xf32> to vector<1x32xf32>
    %106 = vector.extract_strided_slice %103 {offsets = [0, 64], sizes = [1, 32], strides = [1, 1]} : vector<1x128xf32> to vector<1x32xf32>
    %107 = vector.extract_strided_slice %103 {offsets = [0, 96], sizes = [1, 32], strides = [1, 1]} : vector<1x128xf32> to vector<1x32xf32>
    %cst_29 = arith.constant 2.000000e+00 : f32
    %108 = vector.broadcast %cst_29 : f32 to vector<1x32xf32>
    %109 = arith.mulf %108, %107 : vector<1x32xf32>
    %cst_30 = arith.constant 1.000000e+00 : f32
    %110 = vector.broadcast %cst_30 : f32 to vector<1x32xf32>
    %111 = arith.subf %109, %110 : vector<1x32xf32>
    %112 = arith.mulf %105, %88 : vector<1x32xf32>
    %113 = arith.mulf %104, %111 : vector<1x32xf32>
    %114 = arith.addf %112, %113 : vector<1x32xf32>
    %115 = math.tanh %114 : vector<1x32xf32>
    %116 = arith.mulf %106, %115 : vector<1x32xf32>
    %c3 = arith.constant 3 : index
    %c0_31 = arith.constant 0 : index
    %117 = vector.load %arg4[%c3, %c0_31] : memref<8x32xf32, #tpu.memory_space<vmem>>, vector<1x32xf32>
    tpu.vector_store %arg4[%c3, %c0_31], %116 {strides = array<i32>} : memref<8x32xf32, #tpu.memory_space<vmem>>, vector<1x32xf32>,
    %118 = arith.addf %92, %116 : vector<1x32xf32>
    %119 = arith.mulf %116, %116 : vector<1x32xf32>
    %120 = arith.addf %94, %119 : vector<1x32xf32>
    %121 = vector.extract_strided_slice %12 {offsets = [4, 0], sizes = [1, 128], strides = [1, 1]} : vector<8x128xf32> to vector<1x128xf32>
    %122 = arith.truncf %116 : vector<1x32xf32> to vector<1x32xbf16>
    %cst_32 = arith.constant dense<0.000000e+00> : vector<1x128xf32>
    %123 = tpu.matmul %122, %1, %cst_32 {dimension_numbers = #tpu.dot_dimension_numbers<[1], [0], [0], [1], [0, 0, 1, 1], [], []>} : vector<1x32xbf16>, vector<32x128xbf16>, vector<1x128xf32> -> vector<1x128xf32>
    %124 = arith.addf %121, %123 : vector<1x128xf32>
    %125 = arith.negf %124 : vector<1x128xf32>
    %126 = math.exp %125 : vector<1x128xf32>
    %cst_33 = arith.constant 1.000000e+00 : f32
    %127 = vector.broadcast %cst_33 : f32 to vector<1x128xf32>
    %128 = arith.addf %127, %126 : vector<1x128xf32>
    %129 = arith.divf %127, %128 : vector<1x128xf32>
    %130 = vector.extract_strided_slice %129 {offsets = [0, 0], sizes = [1, 32], strides = [1, 1]} : vector<1x128xf32> to vector<1x32xf32>
    %131 = vector.extract_strided_slice %129 {offsets = [0, 32], sizes = [1, 32], strides = [1, 1]} : vector<1x128xf32> to vector<1x32xf32>
    %132 = vector.extract_strided_slice %129 {offsets = [0, 64], sizes = [1, 32], strides = [1, 1]} : vector<1x128xf32> to vector<1x32xf32>
    %133 = vector.extract_strided_slice %129 {offsets = [0, 96], sizes = [1, 32], strides = [1, 1]} : vector<1x128xf32> to vector<1x32xf32>
    %cst_34 = arith.constant 2.000000e+00 : f32
    %134 = vector.broadcast %cst_34 : f32 to vector<1x32xf32>
    %135 = arith.mulf %134, %133 : vector<1x32xf32>
    %cst_35 = arith.constant 1.000000e+00 : f32
    %136 = vector.broadcast %cst_35 : f32 to vector<1x32xf32>
    %137 = arith.subf %135, %136 : vector<1x32xf32>
    %138 = arith.mulf %131, %114 : vector<1x32xf32>
    %139 = arith.mulf %130, %137 : vector<1x32xf32>
    %140 = arith.addf %138, %139 : vector<1x32xf32>
    %141 = math.tanh %140 : vector<1x32xf32>
    %142 = arith.mulf %132, %141 : vector<1x32xf32>
    %c4 = arith.constant 4 : index
    %c0_36 = arith.constant 0 : index
    %143 = vector.load %arg4[%c4, %c0_36] : memref<8x32xf32, #tpu.memory_space<vmem>>, vector<1x32xf32>
    tpu.vector_store %arg4[%c4, %c0_36], %142 {strides = array<i32>} : memref<8x32xf32, #tpu.memory_space<vmem>>, vector<1x32xf32>,
    %144 = arith.addf %118, %142 : vector<1x32xf32>
    %145 = arith.mulf %142, %142 : vector<1x32xf32>
    %146 = arith.addf %120, %145 : vector<1x32xf32>
    %147 = vector.extract_strided_slice %12 {offsets = [5, 0], sizes = [1, 128], strides = [1, 1]} : vector<8x128xf32> to vector<1x128xf32>
    %148 = arith.truncf %142 : vector<1x32xf32> to vector<1x32xbf16>
    %cst_37 = arith.constant dense<0.000000e+00> : vector<1x128xf32>
    %149 = tpu.matmul %148, %1, %cst_37 {dimension_numbers = #tpu.dot_dimension_numbers<[1], [0], [0], [1], [0, 0, 1, 1], [], []>} : vector<1x32xbf16>, vector<32x128xbf16>, vector<1x128xf32> -> vector<1x128xf32>
    %150 = arith.addf %147, %149 : vector<1x128xf32>
    %151 = arith.negf %150 : vector<1x128xf32>
    %152 = math.exp %151 : vector<1x128xf32>
    %cst_38 = arith.constant 1.000000e+00 : f32
    %153 = vector.broadcast %cst_38 : f32 to vector<1x128xf32>
    %154 = arith.addf %153, %152 : vector<1x128xf32>
    %155 = arith.divf %153, %154 : vector<1x128xf32>
    %156 = vector.extract_strided_slice %155 {offsets = [0, 0], sizes = [1, 32], strides = [1, 1]} : vector<1x128xf32> to vector<1x32xf32>
    %157 = vector.extract_strided_slice %155 {offsets = [0, 32], sizes = [1, 32], strides = [1, 1]} : vector<1x128xf32> to vector<1x32xf32>
    %158 = vector.extract_strided_slice %155 {offsets = [0, 64], sizes = [1, 32], strides = [1, 1]} : vector<1x128xf32> to vector<1x32xf32>
    %159 = vector.extract_strided_slice %155 {offsets = [0, 96], sizes = [1, 32], strides = [1, 1]} : vector<1x128xf32> to vector<1x32xf32>
    %cst_39 = arith.constant 2.000000e+00 : f32
    %160 = vector.broadcast %cst_39 : f32 to vector<1x32xf32>
    %161 = arith.mulf %160, %159 : vector<1x32xf32>
    %cst_40 = arith.constant 1.000000e+00 : f32
    %162 = vector.broadcast %cst_40 : f32 to vector<1x32xf32>
    %163 = arith.subf %161, %162 : vector<1x32xf32>
    %164 = arith.mulf %157, %140 : vector<1x32xf32>
    %165 = arith.mulf %156, %163 : vector<1x32xf32>
    %166 = arith.addf %164, %165 : vector<1x32xf32>
    %167 = math.tanh %166 : vector<1x32xf32>
    %168 = arith.mulf %158, %167 : vector<1x32xf32>
    %c5 = arith.constant 5 : index
    %c0_41 = arith.constant 0 : index
    %169 = vector.load %arg4[%c5, %c0_41] : memref<8x32xf32, #tpu.memory_space<vmem>>, vector<1x32xf32>
    tpu.vector_store %arg4[%c5, %c0_41], %168 {strides = array<i32>} : memref<8x32xf32, #tpu.memory_space<vmem>>, vector<1x32xf32>,
    %170 = arith.addf %144, %168 : vector<1x32xf32>
    %171 = arith.mulf %168, %168 : vector<1x32xf32>
    %172 = arith.addf %146, %171 : vector<1x32xf32>
    %173 = vector.extract_strided_slice %12 {offsets = [6, 0], sizes = [1, 128], strides = [1, 1]} : vector<8x128xf32> to vector<1x128xf32>
    %174 = arith.truncf %168 : vector<1x32xf32> to vector<1x32xbf16>
    %cst_42 = arith.constant dense<0.000000e+00> : vector<1x128xf32>
    %175 = tpu.matmul %174, %1, %cst_42 {dimension_numbers = #tpu.dot_dimension_numbers<[1], [0], [0], [1], [0, 0, 1, 1], [], []>} : vector<1x32xbf16>, vector<32x128xbf16>, vector<1x128xf32> -> vector<1x128xf32>
    %176 = arith.addf %173, %175 : vector<1x128xf32>
    %177 = arith.negf %176 : vector<1x128xf32>
    %178 = math.exp %177 : vector<1x128xf32>
    %cst_43 = arith.constant 1.000000e+00 : f32
    %179 = vector.broadcast %cst_43 : f32 to vector<1x128xf32>
    %180 = arith.addf %179, %178 : vector<1x128xf32>
    %181 = arith.divf %179, %180 : vector<1x128xf32>
    %182 = vector.extract_strided_slice %181 {offsets = [0, 0], sizes = [1, 32], strides = [1, 1]} : vector<1x128xf32> to vector<1x32xf32>
    %183 = vector.extract_strided_slice %181 {offsets = [0, 32], sizes = [1, 32], strides = [1, 1]} : vector<1x128xf32> to vector<1x32xf32>
    %184 = vector.extract_strided_slice %181 {offsets = [0, 64], sizes = [1, 32], strides = [1, 1]} : vector<1x128xf32> to vector<1x32xf32>
    %185 = vector.extract_strided_slice %181 {offsets = [0, 96], sizes = [1, 32], strides = [1, 1]} : vector<1x128xf32> to vector<1x32xf32>
    %cst_44 = arith.constant 2.000000e+00 : f32
    %186 = vector.broadcast %cst_44 : f32 to vector<1x32xf32>
    %187 = arith.mulf %186, %185 : vector<1x32xf32>
    %cst_45 = arith.constant 1.000000e+00 : f32
    %188 = vector.broadcast %cst_45 : f32 to vector<1x32xf32>
    %189 = arith.subf %187, %188 : vector<1x32xf32>
    %190 = arith.mulf %183, %166 : vector<1x32xf32>
    %191 = arith.mulf %182, %189 : vector<1x32xf32>
    %192 = arith.addf %190, %191 : vector<1x32xf32>
    %193 = math.tanh %192 : vector<1x32xf32>
    %194 = arith.mulf %184, %193 : vector<1x32xf32>
    %c6 = arith.constant 6 : index
    %c0_46 = arith.constant 0 : index
    %195 = vector.load %arg4[%c6, %c0_46] : memref<8x32xf32, #tpu.memory_space<vmem>>, vector<1x32xf32>
    tpu.vector_store %arg4[%c6, %c0_46], %194 {strides = array<i32>} : memref<8x32xf32, #tpu.memory_space<vmem>>, vector<1x32xf32>,
    %196 = arith.addf %170, %194 : vector<1x32xf32>
    %197 = arith.mulf %194, %194 : vector<1x32xf32>
    %198 = arith.addf %172, %197 : vector<1x32xf32>
    %199 = vector.extract_strided_slice %12 {offsets = [7, 0], sizes = [1, 128], strides = [1, 1]} : vector<8x128xf32> to vector<1x128xf32>
    %200 = arith.truncf %194 : vector<1x32xf32> to vector<1x32xbf16>
    %cst_47 = arith.constant dense<0.000000e+00> : vector<1x128xf32>
    %201 = tpu.matmul %200, %1, %cst_47 {dimension_numbers = #tpu.dot_dimension_numbers<[1], [0], [0], [1], [0, 0, 1, 1], [], []>} : vector<1x32xbf16>, vector<32x128xbf16>, vector<1x128xf32> -> vector<1x128xf32>
    %202 = arith.addf %199, %201 : vector<1x128xf32>
    %203 = arith.negf %202 : vector<1x128xf32>
    %204 = math.exp %203 : vector<1x128xf32>
    %cst_48 = arith.constant 1.000000e+00 : f32
    %205 = vector.broadcast %cst_48 : f32 to vector<1x128xf32>
    %206 = arith.addf %205, %204 : vector<1x128xf32>
    %207 = arith.divf %205, %206 : vector<1x128xf32>
    %208 = vector.extract_strided_slice %207 {offsets = [0, 0], sizes = [1, 32], strides = [1, 1]} : vector<1x128xf32> to vector<1x32xf32>
    %209 = vector.extract_strided_slice %207 {offsets = [0, 32], sizes = [1, 32], strides = [1, 1]} : vector<1x128xf32> to vector<1x32xf32>
    %210 = vector.extract_strided_slice %207 {offsets = [0, 64], sizes = [1, 32], strides = [1, 1]} : vector<1x128xf32> to vector<1x32xf32>
    %211 = vector.extract_strided_slice %207 {offsets = [0, 96], sizes = [1, 32], strides = [1, 1]} : vector<1x128xf32> to vector<1x32xf32>
    %cst_49 = arith.constant 2.000000e+00 : f32
    %212 = vector.broadcast %cst_49 : f32 to vector<1x32xf32>
    %213 = arith.mulf %212, %211 : vector<1x32xf32>
    %cst_50 = arith.constant 1.000000e+00 : f32
    %214 = vector.broadcast %cst_50 : f32 to vector<1x32xf32>
    %215 = arith.subf %213, %214 : vector<1x32xf32>
    %216 = arith.mulf %209, %192 : vector<1x32xf32>
    %217 = arith.mulf %208, %215 : vector<1x32xf32>
    %218 = arith.addf %216, %217 : vector<1x32xf32>
    %219 = math.tanh %218 : vector<1x32xf32>
    %220 = arith.mulf %210, %219 : vector<1x32xf32>
    %c7 = arith.constant 7 : index
    %c0_51 = arith.constant 0 : index
    %221 = vector.load %arg4[%c7, %c0_51] : memref<8x32xf32, #tpu.memory_space<vmem>>, vector<1x32xf32>
    tpu.vector_store %arg4[%c7, %c0_51], %220 {strides = array<i32>} : memref<8x32xf32, #tpu.memory_space<vmem>>, vector<1x32xf32>,
    %222 = arith.addf %196, %220 : vector<1x32xf32>
    %223 = arith.mulf %220, %220 : vector<1x32xf32>
    %224 = arith.addf %198, %223 : vector<1x32xf32>
    %cst_52 = arith.constant 1.250000e-01 : f32
    %225 = vector.broadcast %cst_52 : f32 to vector<1x32xf32>
    %226 = arith.mulf %222, %225 : vector<1x32xf32>
    %cst_53 = arith.constant 1.250000e-01 : f32
    %227 = vector.broadcast %cst_53 : f32 to vector<1x32xf32>
    %228 = arith.mulf %224, %227 : vector<1x32xf32>
    %229 = arith.mulf %226, %226 : vector<1x32xf32>
    %230 = arith.subf %228, %229 : vector<1x32xf32>
    %cst_54 = arith.constant 9.99999974E-6 : f32
    %231 = vector.broadcast %cst_54 : f32 to vector<1x32xf32>
    %232 = arith.addf %230, %231 : vector<1x32xf32>
    %233 = math.rsqrt %232 : vector<1x32xf32>
    %234 = arith.mulf %5, %233 : vector<1x32xf32>
    %235 = arith.mulf %226, %234 : vector<1x32xf32>
    %236 = arith.subf %6, %235 : vector<1x32xf32>
    %c0_55 = arith.constant 0 : index
    %c0_56 = arith.constant 0 : index
    %237 = vector.load %arg4[%c0_55, %c0_56] : memref<8x32xf32, #tpu.memory_space<vmem>>, vector<8x32xf32>
    %238 = vector.broadcast %234 : vector<1x32xf32> to vector<8x32xf32>
    %239 = arith.mulf %237, %238 : vector<8x32xf32>
    %240 = vector.broadcast %236 : vector<1x32xf32> to vector<8x32xf32>
    %241 = arith.addf %239, %240 : vector<8x32xf32>
    %242 = arith.truncf %241 : vector<8x32xf32> to vector<8x32xbf16>
    %cst_57 = arith.constant dense<0.000000e+00> : vector<8x128xf32>
    %243 = tpu.matmul %242, %2, %cst_57 {dimension_numbers = #tpu.dot_dimension_numbers<[1], [0], [0], [1], [0, 0, 1, 1], [], []>} : vector<8x32xbf16>, vector<32x128xbf16>, vector<8x128xf32> -> vector<8x128xf32>
    %244 = vector.broadcast %7 : vector<1x128xf32> to vector<8x128xf32>
    %245 = arith.addf %243, %244 : vector<8x128xf32>
    %c0_58 = arith.constant 0 : index
    %c0_59 = arith.constant 0 : index
    %246 = vector.load %arg3[%c0_58, %c0_59] : memref<8x128xf32, #tpu.memory_space<vmem>>, vector<8x128xf32>
    tpu.vector_store %arg3[%c0_58, %c0_59], %245 {strides = array<i32>} : memref<8x128xf32, #tpu.memory_space<vmem>>, vector<8x128xf32>,
    return
  }
}

</mosaic_0001>

<bundles_post_ra>
// kernel: baseline_lstm_forward.1
= control target key start
LH: loop header
LB: loop body
LE: loop exit
PB: predicated region body
PF: predicated region fallthrough
CT: control target
= control target key end

     0   :  { %8 = vsyncpa [#allocation4], 0  ;;  %s1116_s0 = inlined_call_operand.vmem [shape: f32[8,16], index: 0, kind: input, shape index: {}]   ;;  %s1117_s1 = inlined_call_operand.hbm [shape: bf16[80,128], index: 1, kind: input, shape index: {}]   ;;  %s1118_s2 = inlined_call_operand.vmem [shape: f32[8,128], index: 2, kind: input, shape index: {}]   ;;  %s1119_s3 = inlined_call_operand.hbm [shape: f32[8,128], index: 3, kind: output, shape index: {}]  }
   0x1   :  { %9 = vsyncpa [#allocation5], 0  ;;  %s16_s14 = sshll.u32 %s1117_s1, 4  ;;  %s954_s15 = smov [#allocation3]   ;;  %s17_s14 = int_to_ptr.hbm [resolvable:$true] %s16_s14 }
   0x2   :  { %s18_s16 = sshll.u32 %s954_s15, 4  ;;  %s955_s17 = smov 64   ;;  %s19_s16 = int_to_ptr.vmem [resolvable:$true] %s18_s16 }
   0x3   :  { %s956_s18 = smov 4  }
   0x4   :  { %24 = dma.hbm_to_vmem [thread:$0]  %s17_s14, 640, %s19_s16, [#allocation4], %s955_s17, %s955_s17, %s956_s18  }
   0x5   :  { %950 = dma.done.wait [#allocation4], 640  }
   0x6   :  { %951 = vsyncadd [#allocation4], 4294966656  ;;  %v841_v0 = vld [vmem:[#allocation3] sm:$0xff]  ;;  %v843_v1 = vld [vmem:[#allocation3 + $0x10] sm:$0xff]  ;;  %vm52_vm0 = vcmask 130048   ;;  %v957_v5 = vmov 0  }
   0x7   :  { %v43_v2 = vld [vmem:[%s1116_s0] sm:$0xff]  ;;  %63 = vmatpush.bf16.msra.mxu0 %v841_v0  ;;  %91 = vmatpush.bf16.msra.mxu1 %v843_v1  ;;  %v842_v4 = vld [vmem:[#allocation3 + $0x8] sm:$0xff]  ;;  %vm81_vm5 = vcmask 261120   ;;  %s959_s21 = smov [#allocation6]   ;;  %s786_s25 = sshll.u32 %s1119_s3, 4  ;;  %s787_s25 = int_to_ptr.hbm [resolvable:$true] %s786_s25 }
   0x8   :  { %v44_v3 = vpack.c.bf16 %v43_v2, %v43_v2  ;;  %159 = vmatpush.bf16.msra.mxu2 %v843_v1  ;;  %240 = vmatpush.bf16.msra.mxu3 %v843_v1  ;;  %v991_v6 = vld [vmem:[%s1118_s2] sm:$0xff]  ;;  %s958_s2 = smov 32   ;;  %s784_s22 = sshll.u32 %s959_s21, 4  ;;  %s785_s22 = int_to_ptr.vmem [resolvable:$true] %s784_s22 }
   0x9   :  { %v45_v7 = vperm.slane %v991_v6, 0 }
   0xa   :  { %800 = vmatmul.msk.bf16.vlgmr.msra.gmra.mxu0 %vm52_vm0, %v44_v3 }
   0xb   :  { %320 = vmatpush.bf16.msrb.mxu0 %v843_v1  ;;  %92 = vmatpush.bf16.msra.mxu1 %v842_v4 }
   0xc   :  { %160 = vmatpush.bf16.msra.mxu2 %v842_v4  ;;  %241 = vmatpush.bf16.msra.mxu3 %v842_v4 }
   0xe   :  { %93 = vmatmul.bf16.vlgmr.msra.gmra.mxu1 %v957_v5 }
   0xf   :  { %321 = vmatpush.bf16.msrb.mxu0 %v842_v4  ;;  %402 = vmatpush.bf16.msrb.mxu1 %v843_v1 }
  0x10   :  { %482 = vmatpush.bf16.msrb.mxu2 %v843_v1  ;;  %564 = vmatpush.bf16.msrb.mxu3 %v843_v1 }
  0x13   :  { %644 = vmatpush.bf16.msra.mxu0 %v843_v1  ;;  %403 = vmatpush.bf16.msrb.mxu1 %v842_v4 }
  0x14   :  { %483 = vmatpush.bf16.msrb.mxu2 %v842_v4  ;;  %565 = vmatpush.bf16.msrb.mxu3 %v842_v4 }
  0x17   :  { %645 = vmatpush.bf16.msra.mxu0 %v842_v4 }
  0x87   :  { %v65_v8 = vpop.f32.mrf.mxu0 }
  0x88   :  { %v994_v9 = vadd.f32 %v65_v8, %v45_v7 }
  0x8b   :  { %v94_v10 = vpop.f32.mrf.mxu1 }
  0x8c   :  { %v98_v11 = vadd.f32 %v94_v10, %v994_v9 }
  0x8e   :  { %v809_v12 = vmul.f32 -1.442695, %v98_v11 }
  0x8f   :  { %v67_v13 = vpop.f32.mrf.mxu0 }
  0x90   :  { %852 = vpow2.f32 %v809_v12 }
  0x93   :  { %v96_v14 = vpop.f32.mrf.mxu1 }
  0x96   :  { %v853_v15 = vpop.eup %852 }
  0x97   :  { %v102_v16 = vadd.f32 1.0, %v853_v15 }
  0x99   :  { %854 = vrcp.f32 %v102_v16  ;;  %v114_v20 = vand.u32 2147483648, %v102_v16  ;;  %v112_v22 = vand.u32 2147483647, %v102_v16  ;;  %vm108_vm2 = vweird.f32 %v102_v16 }
  0x9b   :  { %v115_v24 = vor.u32 1.1754944e-38, %v114_v20  ;;  %vm113_vm4 = vcmp.eq.f32.partialorder %v112_v22, 8.507059e+37 }
  0x9f   :  { %v855_v17 = vpop.eup %854 }
  0xa0   :  { %v104_v18 = vmul.f32 %v855_v17, %v102_v16  ;;  %vm109_vm1 = vweird.f32 %v855_v17 }
  0xa1   :  { %vm110_vm3 = vmor %vm108_vm2, %vm109_vm1 }
  0xa2   :  { %v105_v19 = vsub.f32 1.0, %v104_v18 }
  0xa4   :  { %v106_v21 = vmul.f32 %v855_v17, %v105_v19 }
  0xa6   :  { %v107_v23 = vadd.f32 %v855_v17, %v106_v21 }
  0xa8   :  { %v111_v25 = vsel %vm110_vm3, %v855_v17, %v107_v23 }
  0xa9   :  { %v116_v26 = vsel %vm113_vm4, %v115_v24, %v111_v25 }
  0xaa   :  { %v118_v27 = vmul.f32 2.0, %v116_v26  ;;  %v120_v31 = vmul.f32 0.0, %v116_v26 }
  0xac   :  { %v810_v28 = vadd.f32 -1.0, %v118_v27 }
  0xae   :  { %122 = vrot.lane.b32.xlu0 %v810_v28, %s958_s2 }
 0x120   :  { %v123_v29 = vpop.permute.xlu0 %122 }
 0x121   :  { %v125_v30 = vmul.f32 %v123_v29, %v116_v26 }
 0x123   :  { %127 = vrot.lane.b32.xlu0 %v125_v30, %s958_s2 }
 0x195   :  { %v128_v32 = vpop.permute.xlu0 %127 }
 0x196   :  { %v130_v33 = vadd.f32 %v128_v32, %v120_v31 }
 0x198   :  { %856 = vtanh.f32 %v130_v33  ;;  %v192_v60 = vrot.slane %v130_v33, 7 }
 0x19e   :  { %v857_v34 = vpop.eup %856 }
 0x19f   :  { %133 = vrot.lane.b32.xlu1 %v857_v34, %s958_s2 }
 0x211   :  { %v134_v35 = vpop.permute.xlu1 %133 }
 0x212   :  { %v1000_v36 = vmul.f32 %v134_v35, %v116_v26 }
 0x214   :  { %v146_v37 = vpack.c.bf16 %v1000_v36, %v1000_v36 }
 0x216   :  { %148 = vrot.lane.b32.xlu1 %v146_v37, %s955_s17 }
 0x288   :  { %v149_v38 = vpop.permute.xlu1 %148 }
 0x289   :  { %811 = vmatmul.msk.bf16.vlgmr.msra.gmra.mxu2 %vm81_vm5, %v149_v38 }
 0x30c   :  { %v162_v39 = vpop.f32.mrf.mxu2 }
 0x30d   :  { %v167_v40 = vrot.slane %v162_v39, 7 }
 0x30f   :  { %v169_v41 = vadd.f32 %v167_v40, %v994_v9 }
 0x311   :  { %v812_v42 = vmul.f32 -1.442695, %v169_v41 }
 0x313   :  { %858 = vpow2.f32 %v812_v42 }
 0x314   :  { %v164_v43 = vpop.f32.mrf.mxu2 }
 0x319   :  { %v859_v44 = vpop.eup %858 }
 0x31a   :  { %v173_v45 = vadd.f32 1.0, %v859_v44 }
 0x31c   :  { %860 = vrcp.f32 %v173_v45  ;;  %v185_v49 = vand.u32 2147483648, %v173_v45  ;;  %v183_v51 = vand.u32 2147483647, %v173_v45  ;;  %vm179_vm7 = vweird.f32 %v173_v45 }
 0x31e   :  { %v186_v53 = vor.u32 1.1754944e-38, %v185_v49  ;;  %vm184_vm9 = vcmp.eq.f32.partialorder %v183_v51, 8.507059e+37 }
 0x322   :  { %v861_v46 = vpop.eup %860 }
 0x323   :  { %v175_v47 = vmul.f32 %v861_v46, %v173_v45  ;;  %vm180_vm6 = vweird.f32 %v861_v46 }
 0x324   :  { %vm181_vm8 = vmor %vm179_vm7, %vm180_vm6 }
 0x325   :  { %v176_v48 = vsub.f32 1.0, %v175_v47 }
 0x327   :  { %v177_v50 = vmul.f32 %v861_v46, %v176_v48 }
 0x329   :  { %v178_v52 = vadd.f32 %v861_v46, %v177_v50 }
 0x32b   :  { %v182_v54 = vsel %vm181_vm8, %v861_v46, %v178_v52 }
 0x32c   :  { %v187_v55 = vsel %vm184_vm9, %v186_v53, %v182_v54 }
 0x32d   :  { %v189_v56 = vmul.f32 2.0, %v187_v55  ;;  %v194_v61 = vmul.f32 %v192_v60, %v187_v55 }
 0x32f   :  { %v813_v57 = vadd.f32 -1.0, %v189_v56 }
 0x331   :  { %196 = vrot.lane.b32.xlu2 %v813_v57, %s958_s2 }
 0x38b   :  { %v197_v58 = vpop.permute.xlu2 %196 }
 0x38c   :  { %v199_v59 = vmul.f32 %v197_v58, %v187_v55 }
 0x38e   :  { %201 = vrot.lane.b32.xlu2 %v199_v59, %s958_s2 }
 0x3e8   :  { %v202_v62 = vpop.permute.xlu2 %201 }
 0x3e9   :  { %v204_v63 = vadd.f32 %v202_v62, %v194_v61 }
 0x3eb   :  { %862 = vtanh.f32 %v204_v63  ;;  %v273_v29 = vrot.slane %v204_v63, 7 }
 0x3f1   :  { %v863_v0 = vpop.eup %862 }
 0x3f2   :  { %207 = vrot.lane.b32.xlu0 %v863_v0, %s958_s2 }
 0x464   :  { %v208_v1 = vpop.permute.xlu0 %207 }
 0x465   :  { %v1010_v2 = vmul.f32 %v208_v1, %v187_v55 }
 0x467   :  { %v225_v3 = vpack.c.bf16 %v1010_v2, %v1010_v2 }
 0x469   :  { %v227_v4 = vshrl.u32 %v225_v3, 16 }
 0x46b   :  { %229 = vrot.lane.b32.xlu1 %v227_v4, %s955_s17 }
 0x4dd   :  { %v230_v5 = vpop.permute.xlu1 %229 }
 0x4de   :  { %814 = vmatmul.msk.bf16.vlgmr.msra.gmra.mxu3 %vm81_vm5, %v230_v5 }
 0x561   :  { %v243_v7 = vpop.f32.mrf.mxu3 }
 0x562   :  { %v248_v8 = vrot.slane %v243_v7, 6 }
 0x564   :  { %v250_v10 = vadd.f32 %v248_v8, %v994_v9 }
 0x566   :  { %v815_v11 = vmul.f32 -1.442695, %v250_v10 }
 0x568   :  { %864 = vpow2.f32 %v815_v11 }
 0x569   :  { %v245_v12 = vpop.f32.mrf.mxu3 }
 0x56e   :  { %v865_v13 = vpop.eup %864 }
 0x56f   :  { %v254_v14 = vadd.f32 1.0, %v865_v13 }
 0x571   :  { %866 = vrcp.f32 %v254_v14  ;;  %v266_v18 = vand.u32 2147483648, %v254_v14  ;;  %v264_v20 = vand.u32 2147483647, %v254_v14  ;;  %vm260_vm11 = vweird.f32 %v254_v14 }
 0x573   :  { %v267_v22 = vor.u32 1.1754944e-38, %v266_v18  ;;  %vm265_vm13 = vcmp.eq.f32.partialorder %v264_v20, 8.507059e+37 }
 0x577   :  { %v867_v15 = vpop.eup %866 }
 0x578   :  { %v256_v16 = vmul.f32 %v867_v15, %v254_v14  ;;  %vm261_vm10 = vweird.f32 %v867_v15 }
 0x579   :  { %vm262_vm12 = vmor %vm260_vm11, %vm261_vm10 }
 0x57a   :  { %v257_v17 = vsub.f32 1.0, %v256_v16 }
 0x57c   :  { %v258_v19 = vmul.f32 %v867_v15, %v257_v17 }
 0x57e   :  { %v259_v21 = vadd.f32 %v867_v15, %v258_v19 }
 0x580   :  { %v263_v23 = vsel %vm262_vm12, %v867_v15, %v259_v21 }
 0x581   :  { %v268_v24 = vsel %vm265_vm13, %v267_v22, %v263_v23 }
 0x582   :  { %v270_v25 = vmul.f32 2.0, %v268_v24  ;;  %v275_v30 = vmul.f32 %v273_v29, %v268_v24 }
 0x584   :  { %v816_v26 = vadd.f32 -1.0, %v270_v25 }
 0x586   :  { %277 = vrot.lane.b32.xlu2 %v816_v26, %s958_s2 }
 0x5e0   :  { %v278_v27 = vpop.permute.xlu2 %277 }
 0x5e1   :  { %v280_v28 = vmul.f32 %v278_v27, %v268_v24 }
 0x5e3   :  { %282 = vrot.lane.b32.xlu0 %v280_v28, %s958_s2 }
 0x655   :  { %v283_v31 = vpop.permute.xlu0 %282 }
 0x656   :  { %v285_v32 = vadd.f32 %v283_v31, %v275_v30 }
 0x658   :  { %868 = vtanh.f32 %v285_v32  ;;  %v353_v61 = vrot.slane %v285_v32, 7 }
 0x65e   :  { %v869_v33 = vpop.eup %868 }
 0x65f   :  { %288 = vrot.lane.b32.xlu1 %v869_v33, %s958_s2 }
 0x6d1   :  { %v289_v34 = vpop.permute.xlu1 %288 }
 0x6d2   :  { %v1020_v35 = vmul.f32 %v289_v34, %v268_v24 }
 0x6d4   :  { %v306_v37 = vpack.c.bf16 %v1020_v35, %v1020_v35 }
 0x6d6   :  { %v308_v38 = vrot.slane %v306_v37, 1 }
 0x6d8   :  { %309 = vrot.lane.b32.xlu2 %v308_v38, %s955_s17 }
 0x732   :  { %v310_v39 = vpop.permute.xlu2 %309 }
 0x733   :  { %817 = vmatmul.msk.bf16.vlgmr.msrb.gmra.mxu0 %vm81_vm5, %v310_v39 }
 0x7b0   :  { %v323_v40 = vpop.f32.mrf.mxu0 }
 0x7b1   :  { %v328_v41 = vrot.slane %v323_v40, 5 }
 0x7b3   :  { %v330_v42 = vadd.f32 %v328_v41, %v994_v9 }
 0x7b5   :  { %v818_v43 = vmul.f32 -1.442695, %v330_v42 }
 0x7b7   :  { %870 = vpow2.f32 %v818_v43 }
 0x7b8   :  { %v325_v44 = vpop.f32.mrf.mxu0 }
 0x7bd   :  { %v871_v45 = vpop.eup %870 }
 0x7be   :  { %v334_v46 = vadd.f32 1.0, %v871_v45 }
 0x7c0   :  { %872 = vrcp.f32 %v334_v46  ;;  %v346_v50 = vand.u32 2147483648, %v334_v46  ;;  %v344_v52 = vand.u32 2147483647, %v334_v46  ;;  %vm340_vm15 = vweird.f32 %v334_v46 }
 0x7c2   :  { %v347_v54 = vor.u32 1.1754944e-38, %v346_v50  ;;  %vm345_vm1 = vcmp.eq.f32.partialorder %v344_v52, 8.507059e+37 }
 0x7c6   :  { %v873_v47 = vpop.eup %872 }
 0x7c7   :  { %v336_v48 = vmul.f32 %v873_v47, %v334_v46  ;;  %vm341_vm14 = vweird.f32 %v873_v47 }
 0x7c8   :  { %vm342_vm0 = vmor %vm340_vm15, %vm341_vm14 }
 0x7c9   :  { %v337_v49 = vsub.f32 1.0, %v336_v48 }
 0x7cb   :  { %v338_v51 = vmul.f32 %v873_v47, %v337_v49 }
 0x7cd   :  { %v339_v53 = vadd.f32 %v873_v47, %v338_v51 }
 0x7cf   :  { %v343_v55 = vsel %vm342_vm0, %v873_v47, %v339_v53 }
 0x7d0   :  { %v348_v56 = vsel %vm345_vm1, %v347_v54, %v343_v55 }
 0x7d1   :  { %v350_v57 = vmul.f32 2.0, %v348_v56  ;;  %v355_v62 = vmul.f32 %v353_v61, %v348_v56 }
 0x7d3   :  { %v819_v58 = vadd.f32 -1.0, %v350_v57 }
 0x7d5   :  { %357 = vrot.lane.b32.xlu0 %v819_v58, %s958_s2 }
 0x847   :  { %v358_v59 = vpop.permute.xlu0 %357 }
 0x848   :  { %v360_v60 = vmul.f32 %v358_v59, %v348_v56 }
 0x84a   :  { %362 = vrot.lane.b32.xlu1 %v360_v60, %s958_s2 }
 0x8bc   :  { %v363_v63 = vpop.permute.xlu1 %362 }
 0x8bd   :  { %v365_v0 = vadd.f32 %v363_v63, %v355_v62 }
 0x8bf   :  { %874 = vtanh.f32 %v365_v0  ;;  %v435_v32 = vrot.slane %v365_v0, 7 }
 0x8c5   :  { %v875_v1 = vpop.eup %874 }
 0x8c6   :  { %368 = vrot.lane.b32.xlu2 %v875_v1, %s958_s2 }
 0x920   :  { %v369_v3 = vpop.permute.xlu2 %368 }
 0x921   :  { %v1030_v4 = vmul.f32 %v369_v3, %v348_v56 }
 0x923   :  { %v386_v5 = vpack.c.bf16 %v1030_v4, %v1030_v4 }
 0x925   :  { %v388_v7 = vshrl.u32 %v386_v5, 16 }
 0x927   :  { %v390_v8 = vrot.slane %v388_v7, 1 }
 0x929   :  { %391 = vrot.lane.b32.xlu0 %v390_v8, %s955_s17 }
 0x99b   :  { %v392_v10 = vpop.permute.xlu0 %391 }
 0x99c   :  { %820 = vmatmul.msk.bf16.vlgmr.msrb.gmra.mxu1 %vm81_vm5, %v392_v10 }
 0xa19   :  { %v405_v11 = vpop.f32.mrf.mxu1 }
 0xa1a   :  { %v410_v12 = vrot.slane %v405_v11, 4 }
 0xa1c   :  { %v412_v13 = vadd.f32 %v410_v12, %v994_v9 }
 0xa1e   :  { %v821_v14 = vmul.f32 -1.442695, %v412_v13 }
 0xa20   :  { %876 = vpow2.f32 %v821_v14 }
 0xa21   :  { %v407_v15 = vpop.f32.mrf.mxu1 }
 0xa26   :  { %v877_v16 = vpop.eup %876 }
 0xa27   :  { %v416_v17 = vadd.f32 1.0, %v877_v16 }
 0xa29   :  { %878 = vrcp.f32 %v416_v17  ;;  %v428_v21 = vand.u32 2147483648, %v416_v17  ;;  %v426_v23 = vand.u32 2147483647, %v416_v17  ;;  %vm422_vm3 = vweird.f32 %v416_v17 }
 0xa2b   :  { %v429_v25 = vor.u32 1.1754944e-38, %v428_v21  ;;  %vm427_vm6 = vcmp.eq.f32.partialorder %v426_v23, 8.507059e+37 }
 0xa2f   :  { %v879_v18 = vpop.eup %878 }
 0xa30   :  { %v418_v19 = vmul.f32 %v879_v18, %v416_v17  ;;  %vm423_vm2 = vweird.f32 %v879_v18 }
 0xa31   :  { %vm424_vm4 = vmor %vm422_vm3, %vm423_vm2  ;;  %vm141_vm3 = vcmask 253952  }
 0xa32   :  { %v419_v20 = vsub.f32 1.0, %v418_v19 }
 0xa34   :  { %v420_v22 = vmul.f32 %v879_v18, %v419_v20 }
 0xa36   :  { %v421_v24 = vadd.f32 %v879_v18, %v420_v22 }
 0xa38   :  { %v425_v26 = vsel %vm424_vm4, %v879_v18, %v421_v24  ;;  %vm376_vm4 = vcmask 257027  }
 0xa39   :  { %v430_v27 = vsel %vm427_vm6, %v429_v25, %v425_v26  ;;  %vm620_vm6 = vcmask 260102  }
 0xa3a   :  { %v432_v28 = vmul.f32 2.0, %v430_v27  ;;  %v437_v33 = vmul.f32 %v435_v32, %v430_v27 }
 0xa3c   :  { %v822_v29 = vadd.f32 -1.0, %v432_v28 }
 0xa3e   :  { %439 = vrot.lane.b32.xlu1 %v822_v29, %s958_s2 }
 0xab0   :  { %v440_v30 = vpop.permute.xlu1 %439 }
 0xab1   :  { %v442_v31 = vmul.f32 %v440_v30, %v430_v27 }
 0xab3   :  { %444 = vrot.lane.b32.xlu2 %v442_v31, %s958_s2 }
 0xb0d   :  { %v445_v34 = vpop.permute.xlu2 %444 }
 0xb0e   :  { %v447_v37 = vadd.f32 %v445_v34, %v437_v33 }
 0xb10   :  { %880 = vtanh.f32 %v447_v37  ;;  %v515_v1 = vrot.slane %v447_v37, 7 }
 0xb16   :  { %v881_v38 = vpop.eup %880 }
 0xb17   :  { %450 = vrot.lane.b32.xlu0 %v881_v38, %s958_s2 }
 0xb89   :  { %v451_v39 = vpop.permute.xlu0 %450 }
 0xb8a   :  { %v1040_v40 = vmul.f32 %v451_v39, %v430_v27 }
 0xb8c   :  { %v468_v41 = vpack.c.bf16 %v1040_v40, %v1040_v40 }
 0xb8e   :  { %v470_v42 = vrot.slane %v468_v41, 2 }
 0xb90   :  { %471 = vrot.lane.b32.xlu1 %v470_v42, %s955_s17 }
 0xc02   :  { %v472_v43 = vpop.permute.xlu1 %471 }
 0xc03   :  { %823 = vmatmul.msk.bf16.vlgmr.msrb.gmra.mxu2 %vm81_vm5, %v472_v43 }
 0xc86   :  { %v485_v44 = vpop.f32.mrf.mxu2 }
 0xc87   :  { %v490_v45 = vrot.slane %v485_v44, 3 }
 0xc89   :  { %v492_v46 = vadd.f32 %v490_v45, %v994_v9 }
 0xc8b   :  { %v824_v47 = vmul.f32 -1.442695, %v492_v46 }
 0xc8d   :  { %882 = vpow2.f32 %v824_v47 }
 0xc8e   :  { %v487_v48 = vpop.f32.mrf.mxu2 }
 0xc93   :  { %v883_v49 = vpop.eup %882 }
 0xc94   :  { %v496_v50 = vadd.f32 1.0, %v883_v49 }
 0xc96   :  { %884 = vrcp.f32 %v496_v50  ;;  %v508_v54 = vand.u32 2147483648, %v496_v50  ;;  %v506_v56 = vand.u32 2147483647, %v496_v50  ;;  %vm502_vm8 = vweird.f32 %v496_v50 }
 0xc98   :  { %v509_v58 = vor.u32 1.1754944e-38, %v508_v54  ;;  %vm507_vm10 = vcmp.eq.f32.partialorder %v506_v56, 8.507059e+37 }
 0xc9c   :  { %v885_v51 = vpop.eup %884 }
 0xc9d   :  { %v498_v52 = vmul.f32 %v885_v51, %v496_v50  ;;  %vm503_vm7 = vweird.f32 %v885_v51 }
 0xc9e   :  { %vm504_vm9 = vmor %vm502_vm8, %vm503_vm7 }
 0xc9f   :  { %v499_v53 = vsub.f32 1.0, %v498_v52 }
 0xca1   :  { %v500_v55 = vmul.f32 %v885_v51, %v499_v53 }
 0xca3   :  { %v501_v57 = vadd.f32 %v885_v51, %v500_v55 }
 0xca5   :  { %v505_v59 = vsel %vm504_vm9, %v885_v51, %v501_v57 }
 0xca6   :  { %v510_v60 = vsel %vm507_vm10, %v509_v58, %v505_v59  ;;  %vm215_vm10 = vcmask 254977  }
 0xca7   :  { %v512_v61 = vmul.f32 2.0, %v510_v60  ;;  %v517_v3 = vmul.f32 %v515_v1, %v510_v60 }
 0xca9   :  { %v825_v62 = vadd.f32 -1.0, %v512_v61 }
 0xcab   :  { %519 = vrot.lane.b32.xlu2 %v825_v62, %s958_s2 }
 0xd05   :  { %v520_v63 = vpop.permute.xlu2 %519 }
 0xd06   :  { %v522_v0 = vmul.f32 %v520_v63, %v510_v60 }
 0xd08   :  { %524 = vrot.lane.b32.xlu0 %v522_v0, %s958_s2 }
 0xd7a   :  { %v525_v5 = vpop.permute.xlu0 %524 }
 0xd7b   :  { %v527_v7 = vadd.f32 %v525_v5, %v517_v3 }
 0xd7d   :  { %886 = vtanh.f32 %v527_v7  ;;  %v597_v39 = vrot.slane %v527_v7, 7 }
 0xd83   :  { %v887_v8 = vpop.eup %886 }
 0xd84   :  { %530 = vrot.lane.b32.xlu1 %v887_v8, %s958_s2 }
 0xdf6   :  { %v531_v10 = vpop.permute.xlu1 %530 }
 0xdf7   :  { %v1050_v11 = vmul.f32 %v531_v10, %v510_v60 }
 0xdf9   :  { %v548_v12 = vpack.c.bf16 %v1050_v11, %v1050_v11 }
 0xdfb   :  { %v550_v13 = vshrl.u32 %v548_v12, 16 }
 0xdfd   :  { %v552_v14 = vrot.slane %v550_v13, 2 }
 0xdff   :  { %553 = vrot.lane.b32.xlu2 %v552_v14, %s955_s17 }
 0xe59   :  { %v554_v15 = vpop.permute.xlu2 %553 }
 0xe5a   :  { %826 = vmatmul.msk.bf16.vlgmr.msrb.gmra.mxu3 %vm81_vm5, %v554_v15 }
 0xedd   :  { %v567_v16 = vpop.f32.mrf.mxu3 }
 0xede   :  { %v572_v17 = vrot.slane %v567_v16, 2  ;;  %v220_v16 = vmul.f32 %v1010_v2, %v1010_v2 }
 0xee0   :  { %v574_v18 = vadd.f32 %v572_v17, %v994_v9  ;;  %v301_v17 = vmul.f32 %v1020_v35, %v1020_v35 }
 0xee2   :  { %v827_v19 = vmul.f32 -1.442695, %v574_v18  ;;  %v217_v18 = vrot.slane %v1010_v2, 1 }
 0xee4   :  { %888 = vpow2.f32 %v827_v19  ;;  %v222_v19 = vrot.slane %v220_v16, 1 }
 0xee5   :  { %v569_v20 = vpop.f32.mrf.mxu3 }
 0xee6   :  { %v298_v20 = vrot.slane %v1020_v35, 2 }
 0xeea   :  { %v889_v21 = vpop.eup %888 }
 0xeeb   :  { %v578_v22 = vadd.f32 1.0, %v889_v21  ;;  %v381_v21 = vmul.f32 %v1030_v4, %v1030_v4 }
 0xeed   :  { %890 = vrcp.f32 %v578_v22  ;;  %v590_v26 = vand.u32 2147483648, %v578_v22  ;;  %v588_v28 = vand.u32 2147483647, %v578_v22  ;;  %vm584_vm12 = vweird.f32 %v578_v22 }
 0xeef   :  { %v591_v30 = vor.u32 1.1754944e-38, %v590_v26  ;;  %vm589_vm14 = vcmp.eq.f32.partialorder %v588_v28, 8.507059e+37  ;;  %v463_v26 = vmul.f32 %v1040_v40, %v1040_v40 }
 0xef3   :  { %v891_v23 = vpop.eup %890 }
 0xef4   :  { %v580_v24 = vmul.f32 %v891_v23, %v578_v22  ;;  %vm585_vm11 = vweird.f32 %v891_v23  ;;  %v144_v22 = vmul.f32 %v1000_v36, %v1000_v36 }
 0xef5   :  { %vm586_vm13 = vmor %vm584_vm12, %vm585_vm11  ;;  %vm458_vm11 = vcmask 258052   ;;  %vm700_vm12 = vcmask 261127  }
 0xef6   :  { %v581_v25 = vsub.f32 1.0, %v580_v24  ;;  %v219_v24 = vadd.f32 %v217_v18, %v1000_v36 }
 0xef8   :  { %v582_v27 = vmul.f32 %v891_v23, %v581_v25  ;;  %v378_v25 = vrot.slane %v1030_v4, 3  ;;  %v300_v28 = vadd.f32 %v298_v20, %v219_v24  ;;  %v844_v20 = vld [vmem:[#allocation3 + $0x18] sm:$0xff] }
 0xefa   :  { %v583_v29 = vadd.f32 %v891_v23, %v582_v27  ;;  %v224_v27 = vadd.f32 %v222_v19, %v144_v22 }
 0xefc   :  { %v587_v31 = vsel %vm586_vm13, %v891_v23, %v583_v29  ;;  %v303_v23 = vrot.slane %v301_v17, 2  ;;  %v383_v29 = vrot.slane %v381_v21, 3  ;;  %vm296_vm13 = vcmask 256002  }
 0xefd   :  { %v592_v32 = vsel %vm589_vm14, %v591_v30, %v587_v31  ;;  %v460_v30 = vrot.slane %v1040_v40, 4  ;;  %v543_v31 = vmul.f32 %v1050_v11, %v1050_v11  ;;  %vm538_vm14 = vcmask 259077  }
 0xefe   :  { %v594_v33 = vmul.f32 2.0, %v592_v32  ;;  %v599_v41 = vmul.f32 %v597_v39, %v592_v32 }
 0xeff   :  { %v545_v39 = vrot.slane %v543_v31, 5 }
 0xf00   :  { %v828_v34 = vadd.f32 -1.0, %v594_v33  ;;  %v380_v33 = vadd.f32 %v378_v25, %v300_v28  ;;  %v749_v28 = vperm.slane %v991_v6, 3 }
 0xf02   :  { %601 = vrot.lane.b32.xlu0 %v828_v34, %s958_s2  ;;  %v465_v34 = vrot.slane %v463_v26, 4 }
 0xf74   :  { %v602_v37 = vpop.permute.xlu0 %601 }
 0xf75   :  { %v604_v38 = vmul.f32 %v602_v37, %v592_v32  ;;  %v540_v37 = vrot.slane %v1050_v11, 5 }
 0xf77   :  { %606 = vrot.lane.b32.xlu1 %v604_v38, %s958_s2  ;;  %v462_v38 = vadd.f32 %v460_v30, %v380_v33 }
 0xfe9   :  { %v607_v42 = vpop.permute.xlu1 %606 }
 0xfea   :  { %v609_v43 = vadd.f32 %v607_v42, %v599_v41 }
 0xfec   :  { %892 = vtanh.f32 %v609_v43  ;;  %v677_v10 = vrot.slane %v609_v43, 7 }
 0xff2   :  { %v893_v44 = vpop.eup %892 }
 0xff3   :  { %612 = vrot.lane.b32.xlu2 %v893_v44, %s958_s2  ;;  %v542_v44 = vadd.f32 %v540_v37, %v462_v38 }
0x104d   :  { %v613_v45 = vpop.permute.xlu2 %612 }
0x104e   :  { %v1060_v46 = vmul.f32 %v613_v45, %v592_v32  ;;  %v305_v32 = vadd.f32 %v303_v23, %v224_v27 }
0x1050   :  { %v630_v47 = vpack.c.bf16 %v1060_v46, %v1060_v46  ;;  %v622_v41 = vrot.slane %v1060_v46, 6 }
0x1052   :  { %v632_v48 = vrot.slane %v630_v47, 3 }
0x1054   :  { %633 = vrot.lane.b32.xlu0 %v632_v48, %s955_s17 }
0x10c6   :  { %v634_v49 = vpop.permute.xlu0 %633 }
0x10c7   :  { %829 = vmatmul.msk.bf16.vlgmr.msra.gmra.mxu0 %vm81_vm5, %v634_v49  ;;  %v624_v49 = vadd.f32 %v622_v41, %v542_v44 }
0x1144   :  { %v647_v50 = vpop.f32.mrf.mxu0 }
0x1145   :  { %v652_v51 = vrot.slane %v647_v50, 1 }
0x1147   :  { %v654_v52 = vadd.f32 %v652_v51, %v994_v9 }
0x1149   :  { %v830_v53 = vmul.f32 -1.442695, %v654_v52 }
0x114b   :  { %894 = vpow2.f32 %v830_v53 }
0x114c   :  { %v649_v54 = vpop.f32.mrf.mxu0 }
0x1151   :  { %v895_v55 = vpop.eup %894 }
0x1152   :  { %v658_v56 = vadd.f32 1.0, %v895_v55 }
0x1154   :  { %896 = vrcp.f32 %v658_v56  ;;  %v670_v60 = vand.u32 2147483648, %v658_v56  ;;  %v668_v62 = vand.u32 2147483647, %v658_v56  ;;  %vm664_vm0 = vweird.f32 %v658_v56 }
0x1156   :  { %v671_v0 = vor.u32 1.1754944e-38, %v670_v60  ;;  %vm669_vm2 = vcmp.eq.f32.partialorder %v668_v62, 8.507059e+37 }
0x115a   :  { %v897_v57 = vpop.eup %896 }
0x115b   :  { %v660_v58 = vmul.f32 %v897_v57, %v658_v56  ;;  %vm665_vm15 = vweird.f32 %v897_v57 }
0x115c   :  { %vm666_vm1 = vmor %vm664_vm0, %vm665_vm15 }
0x115d   :  { %v661_v59 = vsub.f32 1.0, %v660_v58 }
0x115f   :  { %v662_v61 = vmul.f32 %v897_v57, %v661_v59 }
0x1161   :  { %v663_v63 = vadd.f32 %v897_v57, %v662_v61 }
0x1163   :  { %v667_v1 = vsel %vm666_vm1, %v897_v57, %v663_v63 }
0x1164   :  { %v672_v9 = vsel %vm669_vm2, %v671_v0, %v667_v1 }
0x1165   :  { %v674_v3 = vmul.f32 2.0, %v672_v9  ;;  %v679_v12 = vmul.f32 %v677_v10, %v672_v9 }
0x1167   :  { %v831_v5 = vadd.f32 -1.0, %v674_v3 }
0x1169   :  { %681 = vrot.lane.b32.xlu1 %v831_v5, %s958_s2 }
0x11db   :  { %v682_v7 = vpop.permute.xlu1 %681 }
0x11dc   :  { %v684_v8 = vmul.f32 %v682_v7, %v672_v9 }
0x11de   :  { %686 = vrot.lane.b32.xlu2 %v684_v8, %s958_s2 }
0x1238   :  { %v687_v13 = vpop.permute.xlu2 %686 }
0x1239   :  { %v689_v14 = vadd.f32 %v687_v13, %v679_v12 }
0x123b   :  { %898 = vtanh.f32 %v689_v14 }
0x1241   :  { %v899_v15 = vpop.eup %898 }
0x1242   :  { %692 = vrot.lane.b32.xlu0 %v899_v15, %s958_s2 }
0x124a   :  { %138 = vrot.lane.b32.xlu0 %v1000_v36, %s955_s17  ;;  %v625_v36 = vmul.f32 %v1060_v46, %v1060_v46 }
0x124c   :  { %v627_v45 = vrot.slane %v625_v36, 6 }
0x1252   :  { %373 = vrot.lane.b32.xlu0 %v1030_v4, %s955_s17  ;;  %v385_v4 = vadd.f32 %v383_v29, %v305_v32 }
0x1254   :  { %v467_v43 = vadd.f32 %v465_v34, %v385_v4 }
0x1256   :  { %v547_v48 = vadd.f32 %v545_v39, %v467_v43 }
0x1258   :  { %v629_v52 = vadd.f32 %v627_v45, %v547_v48 }
0x125a   :  { %617 = vrot.lane.b32.xlu0 %v1060_v46, %s955_s17 }
0x12b4   :  { %v693_v42 = vpop.permute.xlu0 %692 }
0x12b5   :  { %v695_v47 = vmul.f32 %v693_v42, %v672_v9 }
0x12b7   :  { %v702_v50 = vrot.slane %v695_v47, 7  ;;  %v705_v51 = vmul.f32 %v695_v47, %v695_v47 }
0x12b9   :  { %v704_v53 = vadd.f32 %v702_v50, %v624_v49  ;;  %v707_v54 = vrot.slane %v705_v51, 7 }
0x12bb   :  { %v709_v55 = vadd.f32 %v707_v54, %v629_v52  ;;  %v710_v56 = vmul.f32 0.125, %v704_v53 }
0x12bc   :  { %v139_v57 = vpop.permute.xlu0 %138 }
0x12bd   :  { %v711_v58 = vmul.f32 0.125, %v709_v55  ;;  %v712_v59 = vmul.f32 %v710_v56, %v710_v56  ;;  %142 = vst.msk [vmem:[#allocation2] sm:$0x1] %vm141_vm3, %v139_v57 }
0x12bf   :  { %v713_v46 = vsub.f32 %v711_v58, %v712_v59 }
0x12c1   :  { %v714_v60 = vadd.f32 1e-05, %v713_v46 }
0x12c3   :  { %900 = vrsqrt.f32 %v714_v60  ;;  %vm721_vm8 = vweird.f32 %v714_v60 }
0x12c4   :  { %v374_v61 = vpop.permute.xlu0 %373 }
0x12c5   :  { %377 = vst.msk [vmem:[#allocation2] sm:$0x8] %vm376_vm4, %v374_v61 }
0x12c9   :  { %v901_v62 = vpop.eup %900 }
0x12ca   :  { %v716_v63 = vmul.f32 %v901_v62, %v714_v60  ;;  %vm722_vm7 = vweird.f32 %v901_v62 }
0x12cb   :  { %vm723_vm9 = vmor %vm721_vm8, %vm722_vm7 }
0x12cc   :  { %v618_v0 = vpop.permute.xlu0 %617  ;;  %v717_v1 = vmul.f32 %v901_v62, %v716_v63 }
0x12cd   :  { %621 = vst.msk [vmem:[#allocation2] sm:$0x40] %vm620_vm6, %v618_v0 }
0x12ce   :  { %v718_v9 = vmul.f32 0.5, %v717_v1 }
0x12d0   :  { %v719_v3 = vsub.f32 1.5, %v718_v9 }
0x12d2   :  { %v720_v5 = vmul.f32 %v901_v62, %v719_v3 }
0x12d4   :  { %v724_v7 = vsel %vm723_vm9, %v901_v62, %v720_v5 }
0x12d5   :  { %v726_v8 = vrot.slane %v724_v7, 7 }
0x12d7   :  { %727 = vrot.lane.b32.xlu1 %v726_v8, %s955_s17 }
0x12df   :  { %212 = vrot.lane.b32.xlu1 %v1010_v2, %s955_s17 }
0x12e7   :  { %455 = vrot.lane.b32.xlu1 %v1040_v40, %s955_s17  ;;  %v845_v40 = vld [vmem:[#allocation3 + $0x20] sm:$0xff] }
0x12e8   :  { %771 = vmatpush.bf16.msra.mxu1 %v845_v40 }
0x12ec   :  { %772 = vmatpush.bf16.msra.mxu1 %v844_v20 }
0x12ef   :  { %697 = vrot.lane.b32.xlu1 %v695_v47, %s955_s17 }
0x1349   :  { %v728_v10 = vpop.permute.xlu1 %727 }
0x134a   :  { %v730_v12 = vmul.f32 %v728_v10, %v991_v6 }
0x134c   :  { %v732_v13 = vrot.slane %v730_v12, 1  ;;  %v744_v22 = vperm.slane %v730_v12, 1 }
0x134e   :  { %733 = vrot.lane.b32.xlu2 %v732_v13, %s955_s17 }
0x1351   :  { %v213_v14 = vpop.permute.xlu1 %212 }
0x1352   :  { %216 = vst.msk [vmem:[#allocation2] sm:$0x2] %vm215_vm10, %v213_v14 }
0x1356   :  { %293 = vrot.lane.b32.xlu2 %v1020_v35, %s955_s17 }
0x1359   :  { %v456_v15 = vpop.permute.xlu1 %455 }
0x135a   :  { %459 = vst.msk [vmem:[#allocation2] sm:$0x10] %vm458_vm11, %v456_v15 }
0x135e   :  { %535 = vrot.lane.b32.xlu2 %v1050_v11, %s955_s17 }
0x1361   :  { %v698_v2 = vpop.permute.xlu1 %697 }
0x1362   :  { %701 = vst.msk [vmem:[#allocation2] sm:$0x80] %vm700_vm12, %v698_v2 }
0x13a8   :  { %v734_v16 = vpop.permute.xlu2 %733 }
0x13a9   :  { %v736_v17 = vmul.f32 %v734_v16, %v710_v56 }
0x13ab   :  { %v738_v18 = vrot.slane %v736_v17, 6 }
0x13ad   :  { %739 = vrot.lane.b32.xlu2 %v738_v18, %s955_s17 }
0x13b0   :  { %v294_v19 = vpop.permute.xlu2 %293 }
0x13b1   :  { %297 = vst.msk [vmem:[#allocation2] sm:$0x4] %vm296_vm13, %v294_v19 }
0x13b8   :  { %v536_v35 = vpop.permute.xlu2 %535 }
0x13b9   :  { %539 = vst.msk [vmem:[#allocation2] sm:$0x20] %vm538_vm14, %v536_v35 }
0x13c0   :  { %v743_v11 = vld [vmem:[#allocation2] sm:$0xff] }
0x13c1   :  { %v745_v24 = vmul.f32 %v744_v22, %v743_v11 }
0x1407   :  { %v740_v21 = vpop.permute.xlu2 %739 }
0x1408   :  { %v742_v23 = vsub.f32 %v991_v6, %v740_v21 }
0x140a   :  { %v746_v25 = vperm.slane %v742_v23, 2 }
0x140c   :  { %v747_v26 = vadd.f32 %v746_v25, %v745_v24 }
0x140e   :  { %v748_v27 = vpack.c.bf16 %v747_v26, %v747_v26 }
0x1410   :  { %840 = vmatmul.msk.bf16.vlgmr.msra.gmra.mxu1 %vm81_vm5, %v748_v27 }
0x148d   :  { %v774_v29 = vpop.f32.mrf.mxu1 }
0x148e   :  { %v775_v30 = vadd.f32 %v774_v29, %v749_v28 }
0x1490   :  { %778 = vst [vmem:[#allocation6] sm:$0xff] %v775_v30 }
0x1491   :  { %789 = dma.vmem_to_hbm [thread:$0]  %s785_s22, 128, %s787_s25, [#allocation5]  }
0x1495   :  { %v776_v31 = vpop.f32.mrf.mxu1 }
0x1496   :  { %952 = dma.done.wait [#allocation5], 128  }
0x1497   :  { %953 = vsyncadd [#allocation5], 4294967168 }
0x1498   :  { %794 = vsyncpa [#allocation4], 1 }
0x1499   :  { %795 = vsyncpa [#allocation5], 1 }

</bundles_post_ra>
